<compile_context>
chip_gen: v7x
topology: tpu7x:2x2x1
jax: 0.10.0
libtpu: 0.0.40
codegen_flags: <defaults>
</compile_context>

<pallas_src>
import jax
import jax.numpy as jnp
from jax.experimental import pallas as pl
from jax.experimental.pallas import tpu as pltpu

# Small, self-consistent sizes (module defaults are 400/200; scaled down).
INPUT_DIM = 64     # e.g. a flattened 8x8 image
HIDDEN_DIM = 32
LATENT_DIM = 16

PACK_W = 128                                        # lane-dense output slab width
PAD_LANES = PACK_W - (INPUT_DIM + 2 * LATENT_DIM)   # 32 unused lanes

BATCH = 64
# Single grid step: the kernel is latency/overhead bound, not VMEM/HBM bound.
# (Set GRID_STEPS = 2 on v7x to split the batch across its two TensorCores.)
GRID_STEPS = 1
TILE_B = BATCH // GRID_STEPS


def _leaky_relu(x, slope=0.2):
    return jnp.where(x > 0, x, slope * x)


def _dot(a, w_ref):
    # bf16 operands on the MXU, f32 accumulation.
    return jnp.dot(a.astype(jnp.bfloat16), w_ref[...],
                   preferred_element_type=jnp.float32)


def vae_kernel(x_ref, eps_ref,
               w1e_ref, b1e_ref, w2e_ref, b2e_ref,   # encoder input1 / input2
               wmv_ref, bmv_ref,                     # fused mean|log_var head
               w1d_ref, b1d_ref, w2d_ref, b2d_ref,   # decoder input1 / input2
               wo_ref, bo_ref,                       # decoder output
               out_ref):
    x = x_ref[...]                                   # [TILE_B, INPUT_DIM]  f32
    eps = eps_ref[...]                               # [TILE_B, LATENT_DIM] f32

    # ----- Encoder -----
    h = _leaky_relu(_dot(x, w1e_ref) + b1e_ref[...])
    h = _leaky_relu(_dot(h, w2e_ref) + b2e_ref[...])
    mv = _dot(h, wmv_ref) + bmv_ref[...]             # [TILE_B, 2*LATENT_DIM]
    mean = mv[:, :LATENT_DIM]
    log_var = mv[:, LATENT_DIM:]

    # ----- Reparameterization: z = mean + exp(0.5 * log_var) * eps (f32) -----
    z = mean + jnp.exp(0.5 * log_var) * eps

    # ----- Decoder -----
    d = _leaky_relu(_dot(z, w1d_ref) + b1d_ref[...])
    d = _leaky_relu(_dot(d, w2d_ref) + b2d_ref[...])
    x_hat = jax.nn.sigmoid(_dot(d, wo_ref) + bo_ref[...])

    # ----- Single lane-dense [TILE_B, 128] store -----
    pad = jnp.zeros((x_hat.shape[0], PAD_LANES), jnp.float32)
    out_ref[...] = jnp.concatenate([x_hat, mean, log_var, pad], axis=-1)


def _cost_estimate(B, params):
    # 2*M*K*N flops per matmul (fused mean|var head counted once).
    flops = 2 * B * (INPUT_DIM * HIDDEN_DIM        # encoder input1
                     + HIDDEN_DIM * HIDDEN_DIM     # encoder input2
                     + HIDDEN_DIM * 2 * LATENT_DIM # fused mean|var head
                     + LATENT_DIM * HIDDEN_DIM     # decoder input1
                     + HIDDEN_DIM * HIDDEN_DIM     # decoder input2
                     + HIDDEN_DIM * INPUT_DIM)     # decoder output
    transcendentals = B * (LATENT_DIM + INPUT_DIM)  # exp (reparam) + sigmoid
    bytes_accessed = (B * INPUT_DIM * 4 + B * LATENT_DIM * 4   # x, eps
                      + B * PACK_W * 4                         # packed output
                      + sum(int(p.size) * p.dtype.itemsize for p in params))
    return pl.CostEstimate(flops=flops, transcendentals=transcendentals,
                           bytes_accessed=bytes_accessed)


@jax.jit
def vae_forward(x, eps, params):
    """x: [B, INPUT_DIM] f32, eps: [B, LATENT_DIM] f32, params: flat tuple."""
    B = x.shape[0]
    assert B % TILE_B == 0, "batch must be a multiple of the batch tile"

    in_specs = [
        pl.BlockSpec((TILE_B, INPUT_DIM), lambda i: (i, 0)),    # x
        pl.BlockSpec((TILE_B, LATENT_DIM), lambda i: (i, 0)),   # eps
    ]
    # Weights / biases: full-array blocks with a constant index_map, so they
    # are loaded once and stay resident in VMEM across grid steps.
    in_specs += [pl.BlockSpec(p.shape, lambda i: (0, 0)) for p in params]

    out = pl.pallas_call(
        vae_kernel,
        out_shape=jax.ShapeDtypeStruct((B, PACK_W), jnp.float32),
        grid=(B // TILE_B,),
        in_specs=in_specs,
        out_specs=pl.BlockSpec((TILE_B, PACK_W), lambda i: (i, 0)),
        compiler_params=pltpu.CompilerParams(
            dimension_semantics=("parallel",)),
        cost_estimate=_cost_estimate(B, params),
    )(x, eps, *params)

    x_hat = out[:, :INPUT_DIM]
    mean = out[:, INPUT_DIM:INPUT_DIM + LATENT_DIM]
    log_var = out[:, INPUT_DIM + LATENT_DIM:INPUT_DIM + 2 * LATENT_DIM]
    return x_hat, mean, log_var


def init_linear(key, fan_in, fan_out):
    """PyTorch-style uniform(-1/sqrt(fan_in), 1/sqrt(fan_in)); W stored [in, out]."""
    kw, kb = jax.random.split(key)
    bound = 1.0 / jnp.sqrt(fan_in)
    w = jax.random.uniform(kw, (fan_in, fan_out), jnp.float32, -bound, bound)
    b = jax.random.uniform(kb, (1, fan_out), jnp.float32, -bound, bound)
    return w.astype(jnp.bfloat16), b           # weights bf16, biases f32


def make_params(key):
    keys = jax.random.split(key, 7)
    w1e, b1e = init_linear(keys[0], INPUT_DIM, HIDDEN_DIM)   # Encoder.input1
    w2e, b2e = init_linear(keys[1], HIDDEN_DIM, HIDDEN_DIM)  # Encoder.input2
    wm, bm = init_linear(keys[2], HIDDEN_DIM, LATENT_DIM)    # Encoder.mean
    wv, bv = init_linear(keys[3], HIDDEN_DIM, LATENT_DIM)    # Encoder.var
    # Fuse mean / var heads into a single [HIDDEN, 2*LATENT] matmul.
    wmv = jnp.concatenate([wm, wv], axis=1)
    bmv = jnp.concatenate([bm, bv], axis=1)
    w1d, b1d = init_linear(keys[4], LATENT_DIM, HIDDEN_DIM)  # Decoder.input1
    w2d, b2d = init_linear(keys[5], HIDDEN_DIM, HIDDEN_DIM)  # Decoder.input2
    wo, bo = init_linear(keys[6], HIDDEN_DIM, INPUT_DIM)     # Decoder.output
    return (w1e, b1e, w2e, b2e, wmv, bmv, w1d, b1d, w2d, b2d, wo, bo)


def vae_reference(x, eps, params):
    """Pure-JAX reference of Model_network.forward (same eps, same bf16 matmul precision)."""
    (w1e, b1e, w2e, b2e, wmv, bmv, w1d, b1d, w2d, b2d, wo, bo) = params

    def dot(a, w):
        return jnp.dot(a.astype(jnp.bfloat16), w,
                       preferred_element_type=jnp.float32)

    h = _leaky_relu(dot(x, w1e) + b1e)
    h = _leaky_relu(dot(h, w2e) + b2e)
    mv = dot(h, wmv) + bmv
    mean, log_var = mv[:, :LATENT_DIM], mv[:, LATENT_DIM:]
    z = mean + jnp.exp(0.5 * log_var) * eps
    d = _leaky_relu(dot(z, w1d) + b1d)
    d = _leaky_relu(dot(d, w2d) + b2d)
    x_hat = jax.nn.sigmoid(dot(d, wo) + bo)
    return x_hat, mean, log_var


if __name__ == "__main__":
    key = jax.random.PRNGKey(0)
    k_x, k_eps, k_p = jax.random.split(key, 3)

    x = jax.random.normal(k_x, (BATCH, INPUT_DIM), jnp.float32)
    # TODO(synk): epsilon (torch.randn_like) is sampled host-side and passed in
    # for deterministic parity; could use pltpu.prng_* inside the kernel
    # instead (seed with program_id if GRID_STEPS > 1).
    eps = jax.random.normal(k_eps, (BATCH, LATENT_DIM), jnp.float32)
    params = make_params(k_p)

    x_hat, mean, log_var = vae_forward(x, eps, params)
    jax.block_until_ready((x_hat, mean, log_var))

    # Sanity check against a precision-matched pure-JAX reference.
    r_xhat, r_mean, r_logvar = vae_reference(x, eps, params)
    assert jnp.allclose(x_hat, r_xhat, atol=1e-3, rtol=1e-3)
    assert jnp.allclose(mean, r_mean, atol=1e-3, rtol=1e-3)
    assert jnp.allclose(log_var, r_logvar, atol=1e-3, rtol=1e-3)

    print("KERNEL_OK")
</pallas_src>

<mosaic_0001>
module attributes {stable_mosaic.version = 11 : i64} {
  func.func @vae_kernel(%arg0: i32, %arg1: memref<64x64xf32, #tpu.memory_space<vmem>>, %arg2: memref<64x16xf32, #tpu.memory_space<vmem>>, %arg3: memref<64x32xbf16, #tpu.memory_space<vmem>>, %arg4: memref<1x32xf32, #tpu.memory_space<vmem>>, %arg5: memref<32x32xbf16, #tpu.memory_space<vmem>>, %arg6: memref<1x32xf32, #tpu.memory_space<vmem>>, %arg7: memref<32x32xbf16, #tpu.memory_space<vmem>>, %arg8: memref<1x32xf32, #tpu.memory_space<vmem>>, %arg9: memref<16x32xbf16, #tpu.memory_space<vmem>>, %arg10: memref<1x32xf32, #tpu.memory_space<vmem>>, %arg11: memref<32x32xbf16, #tpu.memory_space<vmem>>, %arg12: memref<1x32xf32, #tpu.memory_space<vmem>>, %arg13: memref<32x64xbf16, #tpu.memory_space<vmem>>, %arg14: memref<1x64xf32, #tpu.memory_space<vmem>>, %arg15: memref<64x128xf32, #tpu.memory_space<vmem>>) attributes {dimension_semantics = [#tpu.dimension_semantics<parallel>], iteration_bounds = array<i64: 1>, scalar_prefetch = 0 : i64, scratch_operands = 0 : i64, tpu.core_type = #tpu.core_type<tc>, window_params = [{transform_indices = @transform_0, window_bounds = array<i64: 64, 64>}, {transform_indices = @transform_1, window_bounds = array<i64: 64, 16>}, {pipeline_mode = #tpu.pipeline_mode<synchronous>, transform_indices = @transform_2, window_bounds = array<i64: 64, 32>}, {pipeline_mode = #tpu.pipeline_mode<synchronous>, transform_indices = @transform_3, window_bounds = array<i64: 1, 32>}, {pipeline_mode = #tpu.pipeline_mode<synchronous>, transform_indices = @transform_4, window_bounds = array<i64: 32, 32>}, {pipeline_mode = #tpu.pipeline_mode<synchronous>, transform_indices = @transform_5, window_bounds = array<i64: 1, 32>}, {pipeline_mode = #tpu.pipeline_mode<synchronous>, transform_indices = @transform_6, window_bounds = array<i64: 32, 32>}, {pipeline_mode = #tpu.pipeline_mode<synchronous>, transform_indices = @transform_7, window_bounds = array<i64: 1, 32>}, {pipeline_mode = #tpu.pipeline_mode<synchronous>, transform_indices = @transform_8, window_bounds = array<i64: 16, 32>}, {pipeline_mode = #tpu.pipeline_mode<synchronous>, transform_indices = @transform_9, window_bounds = array<i64: 1, 32>}, {pipeline_mode = #tpu.pipeline_mode<synchronous>, transform_indices = @transform_10, window_bounds = array<i64: 32, 32>}, {pipeline_mode = #tpu.pipeline_mode<synchronous>, transform_indices = @transform_11, window_bounds = array<i64: 1, 32>}, {pipeline_mode = #tpu.pipeline_mode<synchronous>, transform_indices = @transform_12, window_bounds = array<i64: 32, 64>}, {pipeline_mode = #tpu.pipeline_mode<synchronous>, transform_indices = @transform_13, window_bounds = array<i64: 1, 64>}, {transform_indices = @transform_14, window_bounds = array<i64: 64, 128>}]} {
    %c0 = arith.constant 0 : index
    %c0_0 = arith.constant 0 : index
    %0 = vector.load %arg1[%c0, %c0_0] : memref<64x64xf32, #tpu.memory_space<vmem>>, vector<64x64xf32>
    %c0_1 = arith.constant 0 : index
    %c0_2 = arith.constant 0 : index
    %1 = vector.load %arg2[%c0_1, %c0_2] : memref<64x16xf32, #tpu.memory_space<vmem>>, vector<64x16xf32>
    %2 = arith.truncf %0 : vector<64x64xf32> to vector<64x64xbf16>
    %c0_3 = arith.constant 0 : index
    %c0_4 = arith.constant 0 : index
    %3 = vector.load %arg3[%c0_3, %c0_4] : memref<64x32xbf16, #tpu.memory_space<vmem>>, vector<64x32xbf16>
    %cst = arith.constant dense<0.000000e+00> : vector<64x32xf32>
    %4 = tpu.matmul %2, %3, %cst {dimension_numbers = #tpu.dot_dimension_numbers<[1], [0], [0], [1], [0, 0, 1, 1], [], []>} : vector<64x64xbf16>, vector<64x32xbf16>, vector<64x32xf32> -> vector<64x32xf32>
    %c0_5 = arith.constant 0 : index
    %c0_6 = arith.constant 0 : index
    %5 = vector.load %arg4[%c0_5, %c0_6] : memref<1x32xf32, #tpu.memory_space<vmem>>, vector<1x32xf32>
    %6 = vector.broadcast %5 : vector<1x32xf32> to vector<64x32xf32>
    %7 = arith.addf %4, %6 : vector<64x32xf32>
    %cst_7 = arith.constant 0.000000e+00 : f32
    %8 = vector.broadcast %cst_7 : f32 to vector<64x32xf32>
    %9 = arith.cmpf ogt, %7, %8 : vector<64x32xf32>
    %cst_8 = arith.constant 2.000000e-01 : f32
    %10 = vector.broadcast %cst_8 : f32 to vector<64x32xf32>
    %11 = arith.mulf %10, %7 : vector<64x32xf32>
    %12 = arith.select %9, %7, %11 : vector<64x32xi1>, vector<64x32xf32>
    %13 = arith.truncf %12 : vector<64x32xf32> to vector<64x32xbf16>
    %c0_9 = arith.constant 0 : index
    %c0_10 = arith.constant 0 : index
    %14 = vector.load %arg5[%c0_9, %c0_10] : memref<32x32xbf16, #tpu.memory_space<vmem>>, vector<32x32xbf16>
    %cst_11 = arith.constant dense<0.000000e+00> : vector<64x32xf32>
    %15 = tpu.matmul %13, %14, %cst_11 {dimension_numbers = #tpu.dot_dimension_numbers<[1], [0], [0], [1], [0, 0, 1, 1], [], []>} : vector<64x32xbf16>, vector<32x32xbf16>, vector<64x32xf32> -> vector<64x32xf32>
    %c0_12 = arith.constant 0 : index
    %c0_13 = arith.constant 0 : index
    %16 = vector.load %arg6[%c0_12, %c0_13] : memref<1x32xf32, #tpu.memory_space<vmem>>, vector<1x32xf32>
    %17 = vector.broadcast %16 : vector<1x32xf32> to vector<64x32xf32>
    %18 = arith.addf %15, %17 : vector<64x32xf32>
    %cst_14 = arith.constant 0.000000e+00 : f32
    %19 = vector.broadcast %cst_14 : f32 to vector<64x32xf32>
    %20 = arith.cmpf ogt, %18, %19 : vector<64x32xf32>
    %cst_15 = arith.constant 2.000000e-01 : f32
    %21 = vector.broadcast %cst_15 : f32 to vector<64x32xf32>
    %22 = arith.mulf %21, %18 : vector<64x32xf32>
    %23 = arith.select %20, %18, %22 : vector<64x32xi1>, vector<64x32xf32>
    %24 = arith.truncf %23 : vector<64x32xf32> to vector<64x32xbf16>
    %c0_16 = arith.constant 0 : index
    %c0_17 = arith.constant 0 : index
    %25 = vector.load %arg7[%c0_16, %c0_17] : memref<32x32xbf16, #tpu.memory_space<vmem>>, vector<32x32xbf16>
    %cst_18 = arith.constant dense<0.000000e+00> : vector<64x32xf32>
    %26 = tpu.matmul %24, %25, %cst_18 {dimension_numbers = #tpu.dot_dimension_numbers<[1], [0], [0], [1], [0, 0, 1, 1], [], []>} : vector<64x32xbf16>, vector<32x32xbf16>, vector<64x32xf32> -> vector<64x32xf32>
    %c0_19 = arith.constant 0 : index
    %c0_20 = arith.constant 0 : index
    %27 = vector.load %arg8[%c0_19, %c0_20] : memref<1x32xf32, #tpu.memory_space<vmem>>, vector<1x32xf32>
    %28 = vector.broadcast %27 : vector<1x32xf32> to vector<64x32xf32>
    %29 = arith.addf %26, %28 : vector<64x32xf32>
    %30 = vector.extract_strided_slice %29 {offsets = [0, 0], sizes = [64, 16], strides = [1, 1]} : vector<64x32xf32> to vector<64x16xf32>
    %31 = vector.extract_strided_slice %29 {offsets = [0, 16], sizes = [64, 16], strides = [1, 1]} : vector<64x32xf32> to vector<64x16xf32>
    %cst_21 = arith.constant 5.000000e-01 : f32
    %32 = vector.broadcast %cst_21 : f32 to vector<64x16xf32>
    %33 = arith.mulf %32, %31 : vector<64x16xf32>
    %34 = math.exp %33 : vector<64x16xf32>
    %35 = arith.mulf %34, %1 : vector<64x16xf32>
    %36 = arith.addf %30, %35 : vector<64x16xf32>
    %37 = arith.truncf %36 : vector<64x16xf32> to vector<64x16xbf16>
    %c0_22 = arith.constant 0 : index
    %c0_23 = arith.constant 0 : index
    %38 = vector.load %arg9[%c0_22, %c0_23] : memref<16x32xbf16, #tpu.memory_space<vmem>>, vector<16x32xbf16>
    %cst_24 = arith.constant dense<0.000000e+00> : vector<64x32xf32>
    %39 = tpu.matmul %37, %38, %cst_24 {dimension_numbers = #tpu.dot_dimension_numbers<[1], [0], [0], [1], [0, 0, 1, 1], [], []>} : vector<64x16xbf16>, vector<16x32xbf16>, vector<64x32xf32> -> vector<64x32xf32>
    %c0_25 = arith.constant 0 : index
    %c0_26 = arith.constant 0 : index
    %40 = vector.load %arg10[%c0_25, %c0_26] : memref<1x32xf32, #tpu.memory_space<vmem>>, vector<1x32xf32>
    %41 = vector.broadcast %40 : vector<1x32xf32> to vector<64x32xf32>
    %42 = arith.addf %39, %41 : vector<64x32xf32>
    %cst_27 = arith.constant 0.000000e+00 : f32
    %43 = vector.broadcast %cst_27 : f32 to vector<64x32xf32>
    %44 = arith.cmpf ogt, %42, %43 : vector<64x32xf32>
    %cst_28 = arith.constant 2.000000e-01 : f32
    %45 = vector.broadcast %cst_28 : f32 to vector<64x32xf32>
    %46 = arith.mulf %45, %42 : vector<64x32xf32>
    %47 = arith.select %44, %42, %46 : vector<64x32xi1>, vector<64x32xf32>
    %48 = arith.truncf %47 : vector<64x32xf32> to vector<64x32xbf16>
    %c0_29 = arith.constant 0 : index
    %c0_30 = arith.constant 0 : index
    %49 = vector.load %arg11[%c0_29, %c0_30] : memref<32x32xbf16, #tpu.memory_space<vmem>>, vector<32x32xbf16>
    %cst_31 = arith.constant dense<0.000000e+00> : vector<64x32xf32>
    %50 = tpu.matmul %48, %49, %cst_31 {dimension_numbers = #tpu.dot_dimension_numbers<[1], [0], [0], [1], [0, 0, 1, 1], [], []>} : vector<64x32xbf16>, vector<32x32xbf16>, vector<64x32xf32> -> vector<64x32xf32>
    %c0_32 = arith.constant 0 : index
    %c0_33 = arith.constant 0 : index
    %51 = vector.load %arg12[%c0_32, %c0_33] : memref<1x32xf32, #tpu.memory_space<vmem>>, vector<1x32xf32>
    %52 = vector.broadcast %51 : vector<1x32xf32> to vector<64x32xf32>
    %53 = arith.addf %50, %52 : vector<64x32xf32>
    %cst_34 = arith.constant 0.000000e+00 : f32
    %54 = vector.broadcast %cst_34 : f32 to vector<64x32xf32>
    %55 = arith.cmpf ogt, %53, %54 : vector<64x32xf32>
    %cst_35 = arith.constant 2.000000e-01 : f32
    %56 = vector.broadcast %cst_35 : f32 to vector<64x32xf32>
    %57 = arith.mulf %56, %53 : vector<64x32xf32>
    %58 = arith.select %55, %53, %57 : vector<64x32xi1>, vector<64x32xf32>
    %59 = arith.truncf %58 : vector<64x32xf32> to vector<64x32xbf16>
    %c0_36 = arith.constant 0 : index
    %c0_37 = arith.constant 0 : index
    %60 = vector.load %arg13[%c0_36, %c0_37] : memref<32x64xbf16, #tpu.memory_space<vmem>>, vector<32x64xbf16>
    %cst_38 = arith.constant dense<0.000000e+00> : vector<64x64xf32>
    %61 = tpu.matmul %59, %60, %cst_38 {dimension_numbers = #tpu.dot_dimension_numbers<[1], [0], [0], [1], [0, 0, 1, 1], [], []>} : vector<64x32xbf16>, vector<32x64xbf16>, vector<64x64xf32> -> vector<64x64xf32>
    %c0_39 = arith.constant 0 : index
    %c0_40 = arith.constant 0 : index
    %62 = vector.load %arg14[%c0_39, %c0_40] : memref<1x64xf32, #tpu.memory_space<vmem>>, vector<1x64xf32>
    %63 = vector.broadcast %62 : vector<1x64xf32> to vector<64x64xf32>
    %64 = arith.addf %61, %63 : vector<64x64xf32>
    %65 = arith.negf %64 : vector<64x64xf32>
    %66 = math.exp %65 : vector<64x64xf32>
    %cst_41 = arith.constant 1.000000e+00 : f32
    %67 = vector.broadcast %cst_41 : f32 to vector<64x64xf32>
    %68 = arith.addf %67, %66 : vector<64x64xf32>
    %69 = arith.divf %67, %68 : vector<64x64xf32>
    %cst_42 = arith.constant 0.000000e+00 : f32
    %70 = vector.broadcast %cst_42 : f32 to vector<64x32xf32>
    %71 = tpu.concatenate %69, %30, %31, %70 in 1 : vector<64x64xf32>, vector<64x16xf32>, vector<64x16xf32>, vector<64x32xf32> -> vector<64x128xf32>
    %c0_43 = arith.constant 0 : index
    %c0_44 = arith.constant 0 : index
    %72 = vector.load %arg15[%c0_43, %c0_44] : memref<64x128xf32, #tpu.memory_space<vmem>>, vector<64x128xf32>
    tpu.vector_store %arg15[%c0_43, %c0_44], %71 {strides = array<i32>} : memref<64x128xf32, #tpu.memory_space<vmem>>, vector<64x128xf32>,
    return
  }
  func.func @transform_0(%arg0: i32) -> (i32, i32) {
    %c0_i32 = arith.constant 0 : i32
    %c0_i32_0 = arith.constant 0 : i32
    return %arg0, %c0_i32 : i32, i32
  }
  func.func @transform_1(%arg0: i32) -> (i32, i32) {
    %c0_i32 = arith.constant 0 : i32
    %c0_i32_0 = arith.constant 0 : i32
    return %arg0, %c0_i32 : i32, i32
  }
  func.func @transform_2(%arg0: i32) -> (i32, i32) {
    %c0_i32 = arith.constant 0 : i32
    %c0_i32_0 = arith.constant 0 : i32
    %c0_i32_1 = arith.constant 0 : i32
    return %c0_i32, %c0_i32_0 : i32, i32
  }
  func.func @transform_3(%arg0: i32) -> (i32, i32) {
    %c0_i32 = arith.constant 0 : i32
    %c0_i32_0 = arith.constant 0 : i32
    %c0_i32_1 = arith.constant 0 : i32
    return %c0_i32, %c0_i32_0 : i32, i32
  }
  func.func @transform_4(%arg0: i32) -> (i32, i32) {
    %c0_i32 = arith.constant 0 : i32
    %c0_i32_0 = arith.constant 0 : i32
    %c0_i32_1 = arith.constant 0 : i32
    return %c0_i32, %c0_i32_0 : i32, i32
  }
  func.func @transform_5(%arg0: i32) -> (i32, i32) {
    %c0_i32 = arith.constant 0 : i32
    %c0_i32_0 = arith.constant 0 : i32
    %c0_i32_1 = arith.constant 0 : i32
    return %c0_i32, %c0_i32_0 : i32, i32
  }
  func.func @transform_6(%arg0: i32) -> (i32, i32) {
    %c0_i32 = arith.constant 0 : i32
    %c0_i32_0 = arith.constant 0 : i32
    %c0_i32_1 = arith.constant 0 : i32
    return %c0_i32, %c0_i32_0 : i32, i32
  }
  func.func @transform_7(%arg0: i32) -> (i32, i32) {
    %c0_i32 = arith.constant 0 : i32
    %c0_i32_0 = arith.constant 0 : i32
    %c0_i32_1 = arith.constant 0 : i32
    return %c0_i32, %c0_i32_0 : i32, i32
  }
  func.func @transform_8(%arg0: i32) -> (i32, i32) {
    %c0_i32 = arith.constant 0 : i32
    %c0_i32_0 = arith.constant 0 : i32
    %c0_i32_1 = arith.constant 0 : i32
    return %c0_i32, %c0_i32_0 : i32, i32
  }
  func.func @transform_9(%arg0: i32) -> (i32, i32) {
    %c0_i32 = arith.constant 0 : i32
    %c0_i32_0 = arith.constant 0 : i32
    %c0_i32_1 = arith.constant 0 : i32
    return %c0_i32, %c0_i32_0 : i32, i32
  }
  func.func @transform_10(%arg0: i32) -> (i32, i32) {
    %c0_i32 = arith.constant 0 : i32
    %c0_i32_0 = arith.constant 0 : i32
    %c0_i32_1 = arith.constant 0 : i32
    return %c0_i32, %c0_i32_0 : i32, i32
  }
  func.func @transform_11(%arg0: i32) -> (i32, i32) {
    %c0_i32 = arith.constant 0 : i32
    %c0_i32_0 = arith.constant 0 : i32
    %c0_i32_1 = arith.constant 0 : i32
    return %c0_i32, %c0_i32_0 : i32, i32
  }
  func.func @transform_12(%arg0: i32) -> (i32, i32) {
    %c0_i32 = arith.constant 0 : i32
    %c0_i32_0 = arith.constant 0 : i32
    %c0_i32_1 = arith.constant 0 : i32
    return %c0_i32, %c0_i32_0 : i32, i32
  }
  func.func @transform_13(%arg0: i32) -> (i32, i32) {
    %c0_i32 = arith.constant 0 : i32
    %c0_i32_0 = arith.constant 0 : i32
    %c0_i32_1 = arith.constant 0 : i32
    return %c0_i32, %c0_i32_0 : i32, i32
  }
  func.func @transform_14(%arg0: i32) -> (i32, i32) {
    %c0_i32 = arith.constant 0 : i32
    %c0_i32_0 = arith.constant 0 : i32
    return %arg0, %c0_i32 : i32, i32
  }
}

</mosaic_0001>

<bundles_post_ra>
// kernel: vae_forward.1
= control target key start
LH: loop header
LB: loop body
LE: loop exit
PB: predicated region body
PF: predicated region fallthrough
CT: control target
= control target key end

     0   :  { %19 = vsyncpa [#allocation3], 0  ;;  %s1281_s29 = smov [#allocation2]   ;;  %s1586_s0 = inlined_call_operand.vmem [shape: f32[64,64], index: 0, kind: input, shape index: {}]   ;;  %s1587_s1 = inlined_call_operand.vmem [shape: f32[64,16], index: 1, kind: input, shape index: {}]   ;;  %s1588_s2 = inlined_call_operand.vmem [shape: bf16[64,32], index: 2, kind: input, shape index: {}]   ;;  %s1589_s3 = inlined_call_operand.vmem [shape: f32[1,32], index: 3, kind: input, shape index: {}]   ;;  %s1590_s4 = inlined_call_operand.vmem [shape: bf16[32,32], index: 4, kind: input, shape index: {}]   ;;  %s1591_s5 = inlined_call_operand.vmem [shape: f32[1,32], index: 5, kind: input, shape index: {}]   ;;  %s1592_s6 = inlined_call_operand.vmem [shape: bf16[32,32], index: 6, kind: input, shape index: {}]   ;;  %s1593_s7 = inlined_call_operand.hbm [shape: f32[1,32], index: 7, kind: input, shape index: {}]   ;;  %s1594_s8 = inlined_call_operand.vmem [shape: bf16[16,32], index: 8, kind: input, shape index: {}]   ;;  %s1595_s9 = inlined_call_operand.vmem [shape: f32[1,32], index: 9, kind: input, shape index: {}]   ;;  %s1596_s10 = inlined_call_operand.vmem [shape: bf16[32,32], index: 10, kind: input, shape index: {}]   ;;  %s1597_s11 = inlined_call_operand.vmem [shape: f32[1,32], index: 11, kind: input, shape index: {}]   ;;  %s1598_s12 = inlined_call_operand.vmem [shape: bf16[32,64], index: 12, kind: input, shape index: {}]   ;;  %s1599_s13 = inlined_call_operand.vmem [shape: f32[1,64], index: 13, kind: input, shape index: {}]   ;;  %s1600_s14 = inlined_call_operand.vmem [shape: f32[64,128], index: 14, kind: output, shape index: {}]  }
   0x1   :  { %s40_s30 = sshll.u32 %s1281_s29, 4  ;;  %s1257_s17 = scalar_lea.hbm %s1593_s7, 16  ;;  %s41_s30 = int_to_ptr.vmem [resolvable:$true] %s40_s30 }
   0x2   :  { %p1258_p0 = scmp.ne.s32.totalorder %s1593_s7, %s1257_s17  ;;  %p1261_p1 = scmp.lt.u32.totalorder %s1257_s17, %s1593_s7 }
   0x4   :  { %p1263_p2 = pnand %p1261_p1, %p1258_p0 }
   0x6   :  { %1266 = shalt.err (!%p1263_p2)
}
   0x7   :  { %s1267_s22 = scalar_lea.vmem %s41_s30, 16  ;;  %s1271_s23 = scalar_lea.vmem %s41_s30, 32 }
   0x8   :  { %p1268_p3 = scmp.ne.s32.totalorder %s41_s30, %s1267_s22  ;;  %p1272_p4 = scmp.lt.s32.totalorder %s41_s30, %s41_s30 }
   0x9   :  { %p1273_p5 = scmp.lt.s32.totalorder %s1271_s23, %s1267_s22 }
   0xb   :  { %p1274_p6 = por %p1273_p5, %p1272_p4 }
   0xd   :  { %p1275_p7 = pnand %p1274_p6, %p1268_p3 }
   0xf   :  { %1278 = shalt.err (!%p1275_p7)
}
  0x10   :  { %43 = dma.hbm_to_vmem [thread:$0]  %s1593_s7, 16, %s41_s30, [#allocation3]  }
  0x11   :  { %1279 = dma.done.wait [#allocation3], 16  }
  0x12   :  { %1280 = vsyncadd [#allocation3], 4294967280  ;;  %v1196_v0 = vld [vmem:[%s1588_s2] sm:$0xff]   ;;  %v1197_v1 = vld [vmem:[%s1588_s2 + $0x8] sm:$0xff]   ;;  %vm119_vm0 = vcmask 523264   ;;  %vm248_vm5 = vcmask 261120  }
  0x13   :  { %1118 = vmatprep.subr.bf16.mxu0 %v1196_v0  ;;  %v1198_v2 = vld [vmem:[%s1588_s2 + $0x10] sm:$0xff]   ;;  %v60_v3 = vld [vmem:[%s1586_s0] sm:$0xff]  ;;  %v61_v4 = vld [vmem:[%s1586_s0 + $0x8] sm:$0xff]  ;;  %s1282_s26 = smov 16   ;;  %s1284_s21 = smov 64  }
  0x14   :  { %1119 = vmatpush3.bf16.msra.mxu0 %v1196_v0  ;;  %v76_v5 = vpack.c.bf16 %v61_v4, %v60_v3  ;;  %v1199_v6 = vld [vmem:[%s1588_s2 + $0x18] sm:$0xff]   ;;  %v62_v7 = vld [vmem:[%s1586_s0 + $0x10] sm:$0xff]  ;;  %v64_v9 = vld [vmem:[%s1586_s0 + $0x20] sm:$0xff] }
  0x15   :  { %1120 = vmatprep.subr.bf16.mxu0 %v1197_v1  ;;  %v63_v8 = vld [vmem:[%s1586_s0 + $0x18] sm:$0xff]  ;;  %v65_v10 = vld [vmem:[%s1586_s0 + $0x28] sm:$0xff]  ;;  %v66_v13 = vld [vmem:[%s1586_s0 + $0x30] sm:$0xff] }
  0x16   :  { %1126 = vmatprep.mubr.msk.bf16.mxu0 %vm119_vm0, %v76_v5  ;;  %v77_v11 = vpack.c.bf16 %v63_v8, %v62_v7  ;;  %v78_v12 = vpack.c.bf16 %v65_v10, %v64_v9  ;;  %v67_v14 = vld [vmem:[%s1586_s0 + $0x38] sm:$0xff]  ;;  %v1200_v16 = vld [vmem:[%s1590_s4] sm:$0xff]   ;;  %v1201_v17 = vld [vmem:[%s1590_s4 + $0x8] sm:$0xff]  }
  0x17   :  { %v79_v15 = vpack.c.bf16 %v67_v14, %v66_v13  ;;  %1134 = vmatprep.subr.bf16.mxu1 %v1200_v16  ;;  %v1202_v18 = vld [vmem:[%s1592_s6] sm:$0xff]   ;;  %v1203_v56 = vld [vmem:[%s1592_s6 + $0x8] sm:$0xff]   ;;  %v70_v58 = vld [vmem:[%s1587_s1 + $0x10] sm:$0xff] }
  0x18   :  { %1121 = vmatpush3.bf16.msra.mxu0 %v1197_v1  ;;  %1135 = vmatpush3.bf16.msra.mxu1 %v1200_v16  ;;  %v1030_v19 = vld [vmem:[%s1589_s3] ss:$0 sm:$0xff]  ;;  %v69_v59 = vld [vmem:[%s1587_s1 + $0x8] sm:$0xff]  ;;  %v71_v60 = vld [vmem:[%s1587_s1 + $0x18] sm:$0xff] }
  0x19   :  { %1122 = vmatprep.subr.bf16.mxu0 %v1198_v2  ;;  %1136 = vmatprep.subr.bf16.mxu1 %v1201_v17  ;;  %v68_v57 = vld [vmem:[%s1587_s1] sm:$0xff]  ;;  %v73_v62 = vld [vmem:[%s1587_s1 + $0x28] sm:$0xff]  ;;  %v74_v63 = vld [vmem:[%s1587_s1 + $0x30] sm:$0xff] }
  0x1a   :  { %486 = vrot.lane.b32.xlu0 %v68_v57, %s1282_s26  ;;  %490 = vrot.lane.b32.xlu1 %v70_v58, %s1282_s26  ;;  %v72_v61 = vld [vmem:[%s1587_s1 + $0x20] sm:$0xff]  ;;  %v75_v0 = vld [vmem:[%s1587_s1 + $0x38] sm:$0xff] }
  0x1b   :  { %v1039_v1 = vld [vmem:[%s1591_s5] ss:$0 sm:$0xff] }
  0x1c   :  { %1123 = vmatpush3.bf16.msra.mxu0 %v1198_v2  ;;  %1137 = vmatpush3.bf16.msra.mxu1 %v1201_v17 }
  0x1d   :  { %1124 = vmatprep.subr.bf16.mxu0 %v1199_v6  ;;  %1146 = vmatprep.subr.bf16.mxu1 %v1202_v18 }
  0x1e   :  { %488 = vrot.lane.b32.xlu0 %v69_v59, %s1282_s26  ;;  %492 = vrot.lane.b32.xlu1 %v71_v60, %s1282_s26 }
  0x20   :  { %1125 = vmatpush3.bf16.msra.mxu0 %v1199_v6 }
  0x22   :  { %494 = vrot.lane.b32.xlu0 %v72_v61, %s1282_s26  ;;  %496 = vrot.lane.b32.xlu1 %v73_v62, %s1282_s26 }
  0x23   :  { %1127 = vmatmul.mubr.msk.bf16.vlgmr.msra.gmra.mrb[0].mxu0 %vm119_vm0, %v77_v11 }
  0x24   :  { %1130 = vmatprep.mubr.msk.bf16.mxu0 %vm119_vm0, %v78_v12 }
  0x26   :  { %498 = vrot.lane.b32.xlu0 %v74_v63, %s1282_s26  ;;  %500 = vrot.lane.b32.xlu1 %v75_v0, %s1282_s26 }
  0x2b   :  { %1131 = vmatmul.mubr.msk.bf16.gmra.mrb[4].mxu0 %vm119_vm0, %v79_v15 }
  0x8c   :  { %v487_v61 = vpop.permute.xlu0 %486 }
  0xf6   :  { %v1128_v20 = vpop.f32.mrb[0].mxu0 }
  0xf7   :  { %v175_v21 = vadd.f32 %v1128_v20, %v1030_v19  ;;  %v166_v22 = vpop.f32.mrb[1].mxu0 }
  0xf8   :  { %v167_v23 = vadd.f32 %v1030_v19, %v166_v22  ;;  %v1129_v24 = vpop.f32.mrb[2].mxu0 }
  0xf9   :  { %v207_v25 = vmul.f32 0.2, %v175_v21  ;;  %v178_v26 = vadd.f32 %v1129_v24, %v1030_v19  ;;  %v169_v27 = vpop.f32.mrb[3].mxu0  ;;  %vm199_vm1 = vcmp.gt.f32.partialorder %v175_v21, 0.0 }
  0xfa   :  { %v205_v28 = vmul.f32 0.2, %v167_v23  ;;  %v170_v29 = vadd.f32 %v1030_v19, %v169_v27  ;;  %vm197_vm3 = vcmp.gt.f32.partialorder %v167_v23, 0.0 }
  0xfb   :  { %vm200_vm2 = vcmp.gt.f32.partialorder %v178_v26, 0.0  ;;  %v208_v30 = vmul.f32 0.2, %v178_v26  ;;  %v215_v32 = vsel %vm199_vm1, %v175_v21, %v207_v25 }
  0xfc   :  { %v206_v31 = vmul.f32 0.2, %v170_v29  ;;  %vm198_vm4 = vcmp.gt.f32.partialorder %v170_v29, 0.0  ;;  %v213_v36 = vsel %vm197_vm3, %v167_v23, %v205_v28  ;;  %vm577_vm3 = vcmask 130048  }
  0xfd   :  { %v216_v33 = vsel %vm200_vm2, %v178_v26, %v208_v30 }
  0xfe   :  { %v222_v34 = vpack.c.bf16 %v216_v33, %v215_v32  ;;  %v1132_v35 = vpop.f32.mrb[4].mxu0  ;;  %v214_v37 = vsel %vm198_vm4, %v170_v29, %v206_v31 }
  0xff   :  { %v191_v38 = vadd.f32 %v1132_v35, %v1030_v19  ;;  %v182_v39 = vpop.f32.mrb[5].mxu0  ;;  %v221_v40 = vpack.c.bf16 %v214_v37, %v213_v36 }
 0x100   :  { %v183_v41 = vadd.f32 %v1030_v19, %v182_v39  ;;  %v1133_v42 = vpop.f32.mrb[6].mxu0  ;;  %v1046_v39 = vld [vmem:[#allocation2] ss:$0 sm:$0xff] }
 0x101   :  { %v211_v43 = vmul.f32 0.2, %v191_v38  ;;  %v194_v44 = vadd.f32 %v1133_v42, %v1030_v19  ;;  %v185_v45 = vpop.f32.mrb[7].mxu0  ;;  %1138 = vmatprep.mubr.msk.bf16.mxu1 %vm248_vm5, %v221_v40  ;;  %vm203_vm6 = vcmp.gt.f32.partialorder %v191_v38, 0.0 }
 0x102   :  { %v209_v46 = vmul.f32 0.2, %v183_v41  ;;  %v186_v47 = vadd.f32 %v1030_v19, %v185_v45  ;;  %1139 = vmatmul.mubr.msk.bf16.vlgmr.msra.gmra.mrb[0].mxu1 %vm248_vm5, %v222_v34  ;;  %vm201_vm7 = vcmp.gt.f32.partialorder %v183_v41, 0.0 }
 0x103   :  { %vm204_vm8 = vcmp.gt.f32.partialorder %v194_v44, 0.0  ;;  %v212_v48 = vmul.f32 0.2, %v194_v44  ;;  %1147 = vmatpush3.bf16.msra.mxu1 %v1202_v18  ;;  %v219_v50 = vsel %vm203_vm6, %v191_v38, %v211_v43  ;;  %v1204_v38 = vld [vmem:[%s1594_s8] sm:$0xff]   ;;  %s1283_s8 = smov 112  }
 0x104   :  { %vm202_vm9 = vcmp.gt.f32.partialorder %v186_v47, 0.0  ;;  %v210_v49 = vmul.f32 0.2, %v186_v47  ;;  %v217_v52 = vsel %vm201_vm7, %v183_v41, %v209_v46  ;;  %1148 = vmatprep.subr.bf16.mxu1 %v1203_v56  ;;  %1158 = vmatprep.subr.bf16.mxu0 %v1204_v38 }
 0x105   :  { %v220_v51 = vsel %vm204_vm8, %v194_v44, %v212_v48  ;;  %1159 = vmatpush3.bf16.msra.mxu0 %v1204_v38 }
 0x106   :  { %v224_v53 = vpack.c.bf16 %v220_v51, %v219_v50  ;;  %v218_v54 = vsel %vm202_vm9, %v186_v47, %v210_v49 }
 0x107   :  { %v223_v55 = vpack.c.bf16 %v218_v54, %v217_v52  ;;  %1149 = vmatpush3.bf16.msra.mxu1 %v1203_v56 }
 0x109   :  { %1142 = vmatprep.mubr.msk.bf16.mxu1 %vm248_vm5, %v223_v55 }
 0x10a   :  { %1143 = vmatmul.mubr.msk.bf16.gmra.mrb[4].mxu1 %vm248_vm5, %v224_v53 }
 0x1d5   :  { %v1140_v2 = vpop.f32.mrb[0].mxu1 }
 0x1d6   :  { %v304_v3 = vadd.f32 %v1140_v2, %v1039_v1  ;;  %v295_v4 = vpop.f32.mrb[1].mxu1 }
 0x1d7   :  { %v296_v5 = vadd.f32 %v1039_v1, %v295_v4  ;;  %v1141_v6 = vpop.f32.mrb[2].mxu1 }
 0x1d8   :  { %v336_v7 = vmul.f32 0.2, %v304_v3  ;;  %v307_v8 = vadd.f32 %v1141_v6, %v1039_v1  ;;  %v298_v9 = vpop.f32.mrb[3].mxu1  ;;  %vm328_vm10 = vcmp.gt.f32.partialorder %v304_v3, 0.0 }
 0x1d9   :  { %v334_v10 = vmul.f32 0.2, %v296_v5  ;;  %v299_v11 = vadd.f32 %v1039_v1, %v298_v9  ;;  %vm326_vm11 = vcmp.gt.f32.partialorder %v296_v5, 0.0 }
 0x1da   :  { %vm329_vm12 = vcmp.gt.f32.partialorder %v307_v8, 0.0  ;;  %v337_v12 = vmul.f32 0.2, %v307_v8  ;;  %v344_v14 = vsel %vm328_vm10, %v304_v3, %v336_v7  ;;  %v491_v3 = vpop.permute.xlu1 %490 }
 0x1db   :  { %vm327_vm13 = vcmp.gt.f32.partialorder %v299_v11, 0.0  ;;  %v335_v13 = vmul.f32 0.2, %v299_v11  ;;  %v342_v16 = vsel %vm326_vm11, %v296_v5, %v334_v10  ;;  %v489_v10 = vpop.permute.xlu0 %488 }
 0x1dc   :  { %v345_v15 = vsel %vm329_vm12, %v307_v8, %v337_v12 }
 0x1dd   :  { %v351_v17 = vpack.c.bf16 %v345_v15, %v344_v14  ;;  %v343_v18 = vsel %vm327_vm13, %v299_v11, %v335_v13  ;;  %v1144_v19 = vpop.f32.mrb[4].mxu1 }
 0x1de   :  { %v350_v20 = vpack.c.bf16 %v343_v18, %v342_v16  ;;  %v320_v21 = vadd.f32 %v1144_v19, %v1039_v1  ;;  %v311_v22 = vpop.f32.mrb[5].mxu1  ;;  %v493_v12 = vpop.permute.xlu1 %492 }
 0x1df   :  { %v312_v23 = vadd.f32 %v1039_v1, %v311_v22  ;;  %v1145_v24 = vpop.f32.mrb[6].mxu1  ;;  %v495_v18 = vpop.permute.xlu0 %494 }
 0x1e0   :  { %v340_v25 = vmul.f32 0.2, %v320_v21  ;;  %v323_v26 = vadd.f32 %v1145_v24, %v1039_v1  ;;  %v314_v27 = vpop.f32.mrb[7].mxu1  ;;  %1150 = vmatprep.mubr.msk.bf16.mxu1 %vm248_vm5, %v350_v20  ;;  %vm332_vm14 = vcmp.gt.f32.partialorder %v320_v21, 0.0 }
 0x1e1   :  { %v338_v28 = vmul.f32 0.2, %v312_v23  ;;  %v315_v29 = vadd.f32 %v1039_v1, %v314_v27  ;;  %1151 = vmatmul.mubr.msk.bf16.vlgmr.msra.gmra.mrb[8].mxu1 %vm248_vm5, %v351_v17  ;;  %vm330_vm15 = vcmp.gt.f32.partialorder %v312_v23, 0.0 }
 0x1e2   :  { %vm333_vm1 = vcmp.gt.f32.partialorder %v323_v26, 0.0  ;;  %v341_v30 = vmul.f32 0.2, %v323_v26  ;;  %v348_v32 = vsel %vm332_vm14, %v320_v21, %v340_v25  ;;  %v497_v20 = vpop.permute.xlu1 %496 }
 0x1e3   :  { %vm331_vm2 = vcmp.gt.f32.partialorder %v315_v29, 0.0  ;;  %v339_v31 = vmul.f32 0.2, %v315_v29  ;;  %v346_v34 = vsel %vm330_vm15, %v312_v23, %v338_v28 }
 0x1e4   :  { %v349_v33 = vsel %vm333_vm1, %v323_v26, %v341_v30  ;;  %v499_v26 = vpop.permute.xlu0 %498 }
 0x1e5   :  { %v353_v35 = vpack.c.bf16 %v349_v33, %v348_v32  ;;  %v347_v36 = vsel %vm331_vm2, %v315_v29, %v339_v31  ;;  %v1205_v32 = vld [vmem:[%s1596_s10] sm:$0xff]  }
 0x1e6   :  { %v352_v37 = vpack.c.bf16 %v347_v36, %v346_v34  ;;  %v501_v29 = vpop.permute.xlu1 %500  ;;  %1168 = vmatprep.subr.bf16.mxu1 %v1205_v32 }
 0x1e7   :  { %1169 = vmatpush3.bf16.msra.mxu1 %v1205_v32 }
 0x1e8   :  { %1154 = vmatprep.mubr.msk.bf16.mxu1 %vm248_vm5, %v352_v37 }
 0x1e9   :  { %1155 = vmatmul.mubr.msk.bf16.gmra.mrb[12].mxu1 %vm248_vm5, %v353_v35 }
 0x2b4   :  { %v1152_v40 = vpop.f32.mrb[8].mxu1 }
 0x2b5   :  { %v1465_v41 = vadd.f32 %v1152_v40, %v1046_v39  ;;  %v423_v42 = vpop.f32.mrb[9].mxu1 }
 0x2b6   :  { %v1467_v43 = vadd.f32 %v1046_v39, %v423_v42  ;;  %v1153_v44 = vpop.f32.mrb[10].mxu1 }
 0x2b7   :  { %v456_v45 = vmul.f32 0.5, %v1465_v41  ;;  %v1470_v46 = vadd.f32 %v1153_v44, %v1046_v39  ;;  %v426_v47 = vpop.f32.mrb[11].mxu1 }
 0x2b8   :  { %v454_v48 = vmul.f32 0.5, %v1467_v43  ;;  %v1473_v49 = vadd.f32 %v1046_v39, %v426_v47 }
 0x2b9   :  { %v466_v50 = vmul.f32 1.442695, %v456_v45  ;;  %v457_v51 = vmul.f32 0.5, %v1470_v46 }
 0x2ba   :  { %v462_v52 = vmul.f32 1.442695, %v454_v48  ;;  %v455_v53 = vmul.f32 0.5, %v1473_v49 }
 0x2bb   :  { %v468_v54 = vmul.f32 1.442695, %v457_v51 }
 0x2bc   :  { %1209 = vpow2.f32 %v462_v52  ;;  %v464_v55 = vmul.f32 1.442695, %v455_v53  ;;  %v1156_v56 = vpop.f32.mrb[12].mxu1  ;;  %v1206_v53 = vld [vmem:[%s1596_s10 + $0x8] sm:$0xff]  }
 0x2bd   :  { %1211 = vpow2.f32 %v466_v50  ;;  %v1477_v57 = vadd.f32 %v1156_v56, %v1046_v39  ;;  %v439_v58 = vpop.f32.mrb[13].mxu1  ;;  %1170 = vmatprep.subr.bf16.mxu1 %v1206_v53 }
 0x2be   :  { %1213 = vpow2.f32 %v464_v55  ;;  %v1479_v59 = vadd.f32 %v1046_v39, %v439_v58  ;;  %v1157_v60 = vpop.f32.mrb[14].mxu1  ;;  %1171 = vmatpush3.bf16.msra.mxu1 %v1206_v53  ;;  %v1053_v55 = vld [vmem:[%s1595_s9] ss:$0 sm:$0xff] }
 0x2bf   :  { %v460_v62 = vmul.f32 0.5, %v1477_v57  ;;  %v1482_v63 = vadd.f32 %v1157_v60, %v1046_v39  ;;  %v442_v0 = vpop.f32.mrb[15].mxu1  ;;  %1215 = vpow2.f32 %v468_v54  ;;  %v1207_v54 = vld [vmem:[%s1598_s12] sm:$0xff]  }
 0x2c0   :  { %v458_v1 = vmul.f32 0.5, %v1479_v59  ;;  %v1485_v2 = vadd.f32 %v1046_v39, %v442_v0  ;;  %1180 = vmatprep.subr.bf16.mxu0 %v1207_v54 }
 0x2c1   :  { %v474_v4 = vmul.f32 1.442695, %v460_v62  ;;  %v461_v5 = vmul.f32 0.5, %v1482_v63 }
 0x2c2   :  { %v470_v6 = vmul.f32 1.442695, %v458_v1  ;;  %v459_v7 = vmul.f32 0.5, %v1485_v2 }
 0x2c3   :  { %v476_v8 = vmul.f32 1.442695, %v461_v5 }
 0x2c4   :  { %1217 = vpow2.f32 %v470_v6  ;;  %v472_v9 = vmul.f32 1.442695, %v459_v7 }
 0x2c5   :  { %1219 = vpow2.f32 %v474_v4 }
 0x2c6   :  { %v1210_v11 = vpop.eup %1209  ;;  %1221 = vpow2.f32 %v472_v9 }
 0x2c7   :  { %v1212_v13 = vpop.eup %1211  ;;  %v510_v14 = vmul.f32 %v1210_v11, %v487_v61  ;;  %1223 = vpow2.f32 %v476_v8 }
 0x2c8   :  { %v1214_v15 = vpop.eup %1213  ;;  %v512_v19 = vmul.f32 %v1212_v13, %v491_v3 }
 0x2c9   :  { %v511_v16 = vmul.f32 %v1214_v15, %v489_v10  ;;  %526 = vrot.lane.b32.xlu0 %v510_v14, %s1283_s8  ;;  %v1216_v17 = vpop.eup %1215 }
 0x2ca   :  { %v513_v21 = vmul.f32 %v1216_v17, %v493_v12 }
 0x2cb   :  { %528 = vrot.lane.b32.xlu1 %v511_v16, %s1283_s8 }
 0x2cd   :  { %530 = vrot.lane.b32.xlu0 %v512_v19, %s1283_s8 }
 0x2ce   :  { %v1218_v22 = vpop.eup %1217 }
 0x2cf   :  { %v1220_v23 = vpop.eup %1219  ;;  %v514_v24 = vmul.f32 %v1218_v22, %v495_v18  ;;  %532 = vrot.lane.b32.xlu1 %v513_v21, %s1283_s8 }
 0x2d0   :  { %v1222_v25 = vpop.eup %1221  ;;  %v516_v30 = vmul.f32 %v1220_v23, %v499_v26 }
 0x2d1   :  { %v515_v27 = vmul.f32 %v1222_v25, %v497_v20  ;;  %534 = vrot.lane.b32.xlu0 %v514_v24, %s1283_s8  ;;  %v1224_v28 = vpop.eup %1223 }
 0x2d2   :  { %v517_v31 = vmul.f32 %v1224_v28, %v501_v29  ;;  %v1208_v28 = vld [vmem:[%s1598_s12 + $0x8] sm:$0xff]   ;;  %v1059_v29 = vld [vmem:[%s1597_s11] ss:$0 sm:$0xff] }
 0x2d3   :  { %536 = vrot.lane.b32.xlu1 %v515_v27, %s1283_s8 }
 0x2d5   :  { %538 = vrot.lane.b32.xlu0 %v516_v30, %s1283_s8 }
 0x2d7   :  { %540 = vrot.lane.b32.xlu1 %v517_v31, %s1283_s8 }
 0x2d9   :  { %967 = vrot.lane.b32.xlu0 %v1467_v43, %s1284_s21 }
 0x2db   :  { %969 = vrot.lane.b32.xlu1 %v1473_v49, %s1284_s21 }
 0x2dd   :  { %971 = vrot.lane.b32.xlu0 %v1465_v41, %s1284_s21 }
 0x2df   :  { %973 = vrot.lane.b32.xlu1 %v1470_v46, %s1284_s21 }
 0x2e1   :  { %975 = vrot.lane.b32.xlu0 %v1479_v59, %s1284_s21 }
 0x2e3   :  { %977 = vrot.lane.b32.xlu1 %v1485_v2, %s1284_s21 }
 0x2e5   :  { %979 = vrot.lane.b32.xlu0 %v1477_v57, %s1284_s21 }
 0x2e7   :  { %981 = vrot.lane.b32.xlu1 %v1482_v63, %s1284_s21 }
 0x33b   :  { %v527_v33 = vpop.permute.xlu0 %526 }
 0x33c   :  { %v550_v35 = vadd.f32 %v527_v33, %v1467_v43 }
 0x33d   :  { %v529_v34 = vpop.permute.xlu1 %528 }
 0x33e   :  { %v551_v36 = vadd.f32 %v529_v34, %v1473_v49 }
 0x33f   :  { %v531_v37 = vpop.permute.xlu0 %530 }
 0x340   :  { %v558_v38 = vpack.c.bf16 %v551_v36, %v550_v35  ;;  %v552_v40 = vadd.f32 %v531_v37, %v1465_v41 }
 0x341   :  { %v533_v39 = vpop.permute.xlu1 %532 }
 0x342   :  { %v553_v42 = vadd.f32 %v533_v39, %v1470_v46  ;;  %1160 = vmatprep.mubr.msk.bf16.mxu0 %vm577_vm3, %v558_v38 }
 0x343   :  { %v535_v44 = vpop.permute.xlu0 %534 }
 0x344   :  { %v559_v45 = vpack.c.bf16 %v553_v42, %v552_v40  ;;  %v554_v48 = vadd.f32 %v535_v44, %v1479_v59 }
 0x345   :  { %v537_v47 = vpop.permute.xlu1 %536 }
 0x346   :  { %v555_v50 = vadd.f32 %v537_v47, %v1485_v2  ;;  %1161 = vmatmul.mubr.msk.bf16.vlgmr.msra.gmra.mrb[8].mxu0 %vm577_vm3, %v559_v45 }
 0x347   :  { %v539_v43 = vpop.permute.xlu0 %538  ;;  %1181 = vmatpush3.bf16.msra.mxu0 %v1207_v54 }
 0x348   :  { %v560_v49 = vpack.c.bf16 %v555_v50, %v554_v48  ;;  %v556_v52 = vadd.f32 %v539_v43, %v1477_v57  ;;  %1182 = vmatprep.subr.bf16.mxu0 %v1208_v28 }
 0x349   :  { %v541_v51 = vpop.permute.xlu1 %540 }
 0x34a   :  { %v557_v41 = vadd.f32 %v541_v51, %v1482_v63  ;;  %1164 = vmatprep.mubr.msk.bf16.mxu0 %vm577_vm3, %v560_v49 }
 0x34b   :  { %1183 = vmatpush3.bf16.msra.mxu0 %v1208_v28 }
 0x34c   :  { %v561_v46 = vpack.c.bf16 %v557_v41, %v556_v52 }
 0x34e   :  { %1165 = vmatmul.mubr.msk.bf16.gmra.mrb[12].mxu0 %vm577_vm3, %v561_v46 }
 0x419   :  { %v1162_v56 = vpop.f32.mrb[8].mxu0 }
 0x41a   :  { %v633_v57 = vadd.f32 %v1162_v56, %v1053_v55  ;;  %v624_v58 = vpop.f32.mrb[9].mxu0 }
 0x41b   :  { %v625_v59 = vadd.f32 %v1053_v55, %v624_v58  ;;  %v1163_v60 = vpop.f32.mrb[10].mxu0 }
 0x41c   :  { %v665_v61 = vmul.f32 0.2, %v633_v57  ;;  %v636_v62 = vadd.f32 %v1163_v60, %v1053_v55  ;;  %v627_v63 = vpop.f32.mrb[11].mxu0  ;;  %vm657_vm4 = vcmp.gt.f32.partialorder %v633_v57, 0.0 }
 0x41d   :  { %v663_v0 = vmul.f32 0.2, %v625_v59  ;;  %v628_v1 = vadd.f32 %v1053_v55, %v627_v63  ;;  %vm655_vm6 = vcmp.gt.f32.partialorder %v625_v59, 0.0 }
 0x41e   :  { %vm658_vm7 = vcmp.gt.f32.partialorder %v636_v62, 0.0  ;;  %v666_v2 = vmul.f32 0.2, %v636_v62  ;;  %v673_v4 = vsel %vm657_vm4, %v633_v57, %v665_v61 }
 0x41f   :  { %vm656_vm8 = vcmp.gt.f32.partialorder %v628_v1, 0.0  ;;  %v664_v3 = vmul.f32 0.2, %v628_v1  ;;  %v671_v6 = vsel %vm655_vm6, %v625_v59, %v663_v0 }
 0x420   :  { %v674_v5 = vsel %vm658_vm7, %v636_v62, %v666_v2  ;;  %v1066_v2 = vld [vmem:[%s1599_s13] ss:$0 sm:$0xff]  ;;  %vm1008_vm7 = vcmask 785408  }
 0x421   :  { %v680_v7 = vpack.c.bf16 %v674_v5, %v673_v4  ;;  %v672_v8 = vsel %vm656_vm8, %v628_v1, %v664_v3  ;;  %v1166_v9 = vpop.f32.mrb[12].mxu0 }
 0x422   :  { %v679_v10 = vpack.c.bf16 %v672_v8, %v671_v6  ;;  %v649_v11 = vadd.f32 %v1166_v9, %v1053_v55  ;;  %v640_v12 = vpop.f32.mrb[13].mxu0 }
 0x423   :  { %v641_v13 = vadd.f32 %v1053_v55, %v640_v12  ;;  %v1167_v14 = vpop.f32.mrb[14].mxu0 }
 0x424   :  { %v669_v15 = vmul.f32 0.2, %v649_v11  ;;  %v652_v16 = vadd.f32 %v1167_v14, %v1053_v55  ;;  %v643_v17 = vpop.f32.mrb[15].mxu0  ;;  %1172 = vmatprep.mubr.msk.bf16.mxu1 %vm248_vm5, %v679_v10  ;;  %vm661_vm9 = vcmp.gt.f32.partialorder %v649_v11, 0.0 }
 0x425   :  { %v667_v18 = vmul.f32 0.2, %v641_v13  ;;  %v644_v19 = vadd.f32 %v1053_v55, %v643_v17  ;;  %1173 = vmatmul.mubr.msk.bf16.vlgmr.msra.gmra.mrb[16].mxu1 %vm248_vm5, %v680_v7  ;;  %vm659_vm10 = vcmp.gt.f32.partialorder %v641_v13, 0.0 }
 0x426   :  { %vm662_vm11 = vcmp.gt.f32.partialorder %v652_v16, 0.0  ;;  %v670_v20 = vmul.f32 0.2, %v652_v16  ;;  %v677_v22 = vsel %vm661_vm9, %v649_v11, %v669_v15 }
 0x427   :  { %vm660_vm12 = vcmp.gt.f32.partialorder %v644_v19, 0.0  ;;  %v668_v21 = vmul.f32 0.2, %v644_v19  ;;  %v675_v24 = vsel %vm659_vm10, %v641_v13, %v667_v18 }
 0x428   :  { %v678_v23 = vsel %vm662_vm11, %v652_v16, %v670_v20 }
 0x429   :  { %v682_v25 = vpack.c.bf16 %v678_v23, %v677_v22  ;;  %v676_v26 = vsel %vm660_vm12, %v644_v19, %v668_v21 }
 0x42a   :  { %v681_v27 = vpack.c.bf16 %v676_v26, %v675_v24 }
 0x42c   :  { %1176 = vmatprep.mubr.msk.bf16.mxu1 %vm248_vm5, %v681_v27 }
 0x42d   :  { %1177 = vmatmul.mubr.msk.bf16.gmra.mrb[20].mxu1 %vm248_vm5, %v682_v25 }
 0x4f8   :  { %v1174_v30 = vpop.f32.mrb[16].mxu1 }
 0x4f9   :  { %v761_v31 = vadd.f32 %v1174_v30, %v1059_v29  ;;  %v752_v32 = vpop.f32.mrb[17].mxu1 }
 0x4fa   :  { %v753_v33 = vadd.f32 %v1059_v29, %v752_v32  ;;  %v1175_v34 = vpop.f32.mrb[18].mxu1 }
 0x4fb   :  { %v793_v35 = vmul.f32 0.2, %v761_v31  ;;  %v764_v36 = vadd.f32 %v1175_v34, %v1059_v29  ;;  %v755_v37 = vpop.f32.mrb[19].mxu1  ;;  %vm785_vm13 = vcmp.gt.f32.partialorder %v761_v31, 0.0 }
 0x4fc   :  { %v791_v38 = vmul.f32 0.2, %v753_v33  ;;  %v756_v39 = vadd.f32 %v1059_v29, %v755_v37  ;;  %vm783_vm14 = vcmp.gt.f32.partialorder %v753_v33, 0.0 }
 0x4fd   :  { %vm786_vm15 = vcmp.gt.f32.partialorder %v764_v36, 0.0  ;;  %v794_v40 = vmul.f32 0.2, %v764_v36  ;;  %v801_v44 = vsel %vm785_vm13, %v761_v31, %v793_v35 }
 0x4fe   :  { %vm784_vm1 = vcmp.gt.f32.partialorder %v756_v39, 0.0  ;;  %v792_v42 = vmul.f32 0.2, %v756_v39  ;;  %v799_v47 = vsel %vm783_vm14, %v753_v33, %v791_v38  ;;  %v968_v33 = vpop.permute.xlu0 %967 }
 0x4ff   :  { %v802_v45 = vsel %vm786_vm15, %v764_v36, %v794_v40  ;;  %v970_v36 = vpop.permute.xlu1 %969 }
 0x500   :  { %v808_v48 = vpack.c.bf16 %v802_v45, %v801_v44  ;;  %v800_v50 = vsel %vm784_vm1, %v756_v39, %v792_v42  ;;  %v1178_v43 = vpop.f32.mrb[20].mxu1 }
 0x501   :  { %v807_v49 = vpack.c.bf16 %v800_v50, %v799_v47  ;;  %v777_v51 = vadd.f32 %v1178_v43, %v1059_v29  ;;  %v768_v52 = vpop.f32.mrb[21].mxu1 }
 0x502   :  { %v769_v41 = vadd.f32 %v1059_v29, %v768_v52  ;;  %v1179_v46 = vpop.f32.mrb[22].mxu1  ;;  %v972_v39 = vpop.permute.xlu0 %971 }
 0x503   :  { %v797_v53 = vmul.f32 0.2, %v777_v51  ;;  %v780_v54 = vadd.f32 %v1179_v46, %v1059_v29  ;;  %v771_v55 = vpop.f32.mrb[23].mxu1  ;;  %1184 = vmatprep.mubr.msk.bf16.mxu0 %vm248_vm5, %v807_v49  ;;  %vm789_vm2 = vcmp.gt.f32.partialorder %v777_v51, 0.0  ;;  %v974_v47 = vpop.permute.xlu1 %973 }
 0x504   :  { %v795_v56 = vmul.f32 0.2, %v769_v41  ;;  %v772_v57 = vadd.f32 %v1059_v29, %v771_v55  ;;  %1185 = vmatmul.mubr.msk.bf16.vlgmr.msra.gmra.mrb[16].mxu0 %vm248_vm5, %v808_v48  ;;  %vm787_vm3 = vcmp.gt.f32.partialorder %v769_v41, 0.0 }
 0x505   :  { %vm790_vm4 = vcmp.gt.f32.partialorder %v780_v54, 0.0  ;;  %v798_v58 = vmul.f32 0.2, %v780_v54  ;;  %v805_v60 = vsel %vm789_vm2, %v777_v51, %v797_v53 }
 0x506   :  { %vm788_vm6 = vcmp.gt.f32.partialorder %v772_v57, 0.0  ;;  %v796_v59 = vmul.f32 0.2, %v772_v57  ;;  %v803_v62 = vsel %vm787_vm3, %v769_v41, %v795_v56  ;;  %v976_v41 = vpop.permute.xlu0 %975 }
 0x507   :  { %v806_v61 = vsel %vm790_vm4, %v780_v54, %v798_v58  ;;  %v978_v58 = vpop.permute.xlu1 %977 }
 0x508   :  { %v810_v63 = vpack.c.bf16 %v806_v61, %v805_v60  ;;  %v804_v0 = vsel %vm788_vm6, %v772_v57, %v796_v59 }
 0x509   :  { %v809_v1 = vpack.c.bf16 %v804_v0, %v803_v62 }
 0x50b   :  { %1188 = vmatprep.mubr.msk.bf16.mxu0 %vm248_vm5, %v809_v1 }
 0x50c   :  { %1189 = vmatmul.mubr.msk.bf16.gmra.mrb[20].mxu0 %vm248_vm5, %v810_v63  ;;  %vm999_vm5 = vcmask 654336  }
 0x5d7   :  { %v1186_v3 = vpop.f32.mrb[16].mxu0 }
 0x5d8   :  { %v889_v4 = vadd.f32 %v1186_v3, %v1066_v2  ;;  %v880_v5 = vpop.f32.mrb[17].mxu0 }
 0x5d9   :  { %v881_v6 = vadd.f32 %v1066_v2, %v880_v5  ;;  %v1187_v7 = vpop.f32.mrb[18].mxu0 }
 0x5da   :  { %v1075_v8 = vmul.f32 -1.442695, %v889_v4  ;;  %v892_v9 = vadd.f32 %v1187_v7, %v1066_v2  ;;  %v883_v10 = vpop.f32.mrb[19].mxu0 }
 0x5db   :  { %v1073_v11 = vmul.f32 -1.442695, %v881_v6  ;;  %v884_v12 = vadd.f32 %v1066_v2, %v883_v10  ;;  %v982_v6 = vpop.permute.xlu1 %981 }
 0x5dc   :  { %1225 = vpow2.f32 %v1075_v8  ;;  %v1076_v13 = vmul.f32 -1.442695, %v892_v9 }
 0x5dd   :  { %1227 = vpow2.f32 %v1073_v11  ;;  %v1074_v14 = vmul.f32 -1.442695, %v884_v12 }
 0x5de   :  { %1229 = vpow2.f32 %v1076_v13 }
 0x5df   :  { %1231 = vpow2.f32 %v1074_v14  ;;  %v1190_v15 = vpop.f32.mrb[20].mxu0 }
 0x5e0   :  { %v905_v16 = vadd.f32 %v1190_v15, %v1066_v2  ;;  %v896_v17 = vpop.f32.mrb[21].mxu0 }
 0x5e1   :  { %v897_v18 = vadd.f32 %v1066_v2, %v896_v17  ;;  %v1191_v19 = vpop.f32.mrb[22].mxu0 }
 0x5e2   :  { %v1079_v20 = vmul.f32 -1.442695, %v905_v16  ;;  %v908_v21 = vadd.f32 %v1191_v19, %v1066_v2  ;;  %v899_v22 = vpop.f32.mrb[23].mxu0 }
 0x5e3   :  { %v1077_v23 = vmul.f32 -1.442695, %v897_v18  ;;  %v900_v24 = vadd.f32 %v1066_v2, %v899_v22  ;;  %v980_v2 = vpop.permute.xlu0 %979 }
 0x5e4   :  { %1233 = vpow2.f32 %v1079_v20  ;;  %v1080_v25 = vmul.f32 -1.442695, %v908_v21 }
 0x5e5   :  { %1235 = vpow2.f32 %v1077_v23  ;;  %v1078_v26 = vmul.f32 -1.442695, %v900_v24 }
 0x5e6   :  { %v1226_v27 = vpop.eup %1225  ;;  %1237 = vpow2.f32 %v1080_v25 }
 0x5e7   :  { %v1228_v28 = vpop.eup %1227  ;;  %v937_v29 = vadd.f32 1.0, %v1226_v27  ;;  %1239 = vpow2.f32 %v1078_v26 }
 0x5e8   :  { %v1230_v30 = vpop.eup %1229  ;;  %v935_v31 = vadd.f32 1.0, %v1228_v28 }
 0x5e9   :  { %v1232_v32 = vpop.eup %1231  ;;  %1241 = vrcp.f32 %v937_v29  ;;  %v938_v34 = vadd.f32 1.0, %v1230_v30 }
 0x5ea   :  { %1243 = vrcp.f32 %v935_v31  ;;  %v936_v35 = vadd.f32 1.0, %v1232_v32 }
 0x5eb   :  { %1245 = vrcp.f32 %v938_v34 }
 0x5ec   :  { %1247 = vrcp.f32 %v936_v35 }
 0x5ee   :  { %v1234_v37 = vpop.eup %1233 }
 0x5ef   :  { %v1236_v38 = vpop.eup %1235  ;;  %v941_v40 = vadd.f32 1.0, %v1234_v37 }
 0x5f0   :  { %v1238_v42 = vpop.eup %1237  ;;  %v939_v44 = vadd.f32 1.0, %v1236_v38 }
 0x5f1   :  { %v1240_v45 = vpop.eup %1239  ;;  %1249 = vrcp.f32 %v941_v40  ;;  %v942_v48 = vadd.f32 1.0, %v1238_v42 }
 0x5f2   :  { %1251 = vrcp.f32 %v939_v44  ;;  %v940_v50 = vadd.f32 1.0, %v1240_v45 }
 0x5f3   :  { %v1242_v43 = vpop.eup %1241  ;;  %1253 = vrcp.f32 %v942_v48 }
 0x5f4   :  { %v1244_v49 = vpop.eup %1243  ;;  %v993_v51 = vsel %vm119_vm0, %v1242_v43, %v972_v39  ;;  %1255 = vrcp.f32 %v940_v50 }
 0x5f5   :  { %v1246_v52 = vpop.eup %1245  ;;  %v1002_v46 = vsel %vm999_vm5, %v993_v51, %v972_v39  ;;  %v991_v53 = vsel %vm119_vm0, %v1244_v49, %v968_v33 }
 0x5f6   :  { %v1248_v54 = vpop.eup %1247  ;;  %v1011_v55 = vsel %vm1008_vm7, %v1002_v46, 0.0  ;;  %v1000_v56 = vsel %vm999_vm5, %v991_v53, %v968_v33  ;;  %v994_v57 = vsel %vm119_vm0, %v1246_v52, %v974_v47 }
 0x5f7   :  { %1019 = vst [vmem:[%s1600_s14 + $0x10] sm:$0xff] %v1011_v55  ;;  %v1009_v59 = vsel %vm1008_vm7, %v1000_v56, 0.0  ;;  %v1003_v60 = vsel %vm999_vm5, %v994_v57, %v974_v47  ;;  %v992_v61 = vsel %vm119_vm0, %v1248_v54, %v970_v36 }
 0x5f8   :  { %1017 = vst [vmem:[%s1600_s14] sm:$0xff] %v1009_v59  ;;  %v1012_v62 = vsel %vm1008_vm7, %v1003_v60, 0.0  ;;  %v1001_v63 = vsel %vm999_vm5, %v992_v61, %v970_v36 }
 0x5f9   :  { %1020 = vst [vmem:[%s1600_s14 + $0x18] sm:$0xff] %v1012_v62  ;;  %v1010_v0 = vsel %vm1008_vm7, %v1001_v63, 0.0 }
 0x5fa   :  { %1018 = vst [vmem:[%s1600_s14 + $0x8] sm:$0xff] %v1010_v0 }
 0x5fb   :  { %v1250_v1 = vpop.eup %1249 }
 0x5fc   :  { %v1252_v3 = vpop.eup %1251  ;;  %v997_v4 = vsel %vm119_vm0, %v1250_v1, %v980_v2 }
 0x5fd   :  { %v1254_v5 = vpop.eup %1253  ;;  %v1006_v7 = vsel %vm999_vm5, %v997_v4, %v980_v2  ;;  %v995_v8 = vsel %vm119_vm0, %v1252_v3, %v976_v41 }
 0x5fe   :  { %v1256_v9 = vpop.eup %1255  ;;  %v1015_v10 = vsel %vm1008_vm7, %v1006_v7, 0.0  ;;  %v1004_v11 = vsel %vm999_vm5, %v995_v8, %v976_v41  ;;  %v998_v12 = vsel %vm119_vm0, %v1254_v5, %v982_v6 }
 0x5ff   :  { %1023 = vst [vmem:[%s1600_s14 + $0x30] sm:$0xff] %v1015_v10  ;;  %v1013_v13 = vsel %vm1008_vm7, %v1004_v11, 0.0  ;;  %v1007_v14 = vsel %vm999_vm5, %v998_v12, %v982_v6  ;;  %v996_v15 = vsel %vm119_vm0, %v1256_v9, %v978_v58 }
 0x600   :  { %1021 = vst [vmem:[%s1600_s14 + $0x20] sm:$0xff] %v1013_v13  ;;  %v1016_v16 = vsel %vm1008_vm7, %v1007_v14, 0.0  ;;  %v1005_v17 = vsel %vm999_vm5, %v996_v15, %v978_v58 }
 0x601   :  { %1024 = vst [vmem:[%s1600_s14 + $0x38] sm:$0xff] %v1016_v16  ;;  %v1014_v18 = vsel %vm1008_vm7, %v1005_v17, 0.0 }
 0x602   :  { %1022 = vst [vmem:[%s1600_s14 + $0x28] sm:$0xff] %v1014_v18 }
 0x603   :  { %1029 = vsyncpa [#allocation3], 1 }

</bundles_post_ra>
